<compile_context>
chip_gen: v7x
topology: tpu7x:2x2x1
jax: 0.10.0
libtpu: 0.0.40
codegen_flags: <defaults>
</compile_context>

<pallas_src>
import functools
from typing import NamedTuple

import jax
import jax.numpy as jnp
from jax.experimental import pallas as pl
from jax.experimental.pallas import tpu as pltpu


# ----------------------------------------------------------------------------
# Kernel
# ----------------------------------------------------------------------------
def rnn_cell_kernel(xh_ref, w1_ref, b1_ref, w2_ref, b2_ref, out_ref, hid_ref):
    """Fused RNN cell: one MXU matmul + tanh, then matmul + stable softmax.

    xh_ref : (TB, Kp) bf16   concatenated [x | h] (zero padded)
    w1_ref : (Kp, Hp) bf16   packed [Wxh ; Whh] (zero padded)
    b1_ref : (1, Hp)  f32    bxh + bhh (zero padded)
    w2_ref : (Hp, Op) bf16   Why (zero padded)
    b2_ref : (1, Op)  f32    bhy, padded cols = -1e30 (mask folded into bias)
    out_ref: (TB, Op) f32    softmax probabilities (padded cols == 0)
    hid_ref: (TB, Hp) f32    tanh hidden state
    """
    xh = xh_ref[...]

    # hidden = tanh([x|h] @ [Wxh;Whh] + (bxh+bhh)) -- single MXU pass, f32 acc.
    pre = jnp.dot(xh, w1_ref[...], preferred_element_type=jnp.float32)
    hidden = jnp.tanh(pre + b1_ref[...])                        # f32, (TB, Hp)

    # logits = hidden @ Why + bhy ; padded columns land at -1e30 via b2.
    logits = jnp.dot(hidden.astype(w2_ref.dtype), w2_ref[...],
                     preferred_element_type=jnp.float32)
    logits = logits + b2_ref[...]

    # Numerically-stable softmax (exact normalization).
    m = jnp.max(logits, axis=-1, keepdims=True)
    e = jnp.exp(logits - m)                                     # padded cols -> 0
    denom = jnp.sum(e, axis=-1, keepdims=True)
    out_ref[...] = (e / denom).astype(out_ref.dtype)
    hid_ref[...] = hidden.astype(hid_ref.dtype)


# ----------------------------------------------------------------------------
# Packing / sizing helpers
# ----------------------------------------------------------------------------
def _round_up(n, m):
    return ((n + m - 1) // m) * m


def _round_feat(n):
    # 128-lane tiles; use 256-wide tiles for >=256 dims (v6e/v7x 256x256 MXU).
    return _round_up(n, 256) if n >= 256 else _round_up(n, 128)


def _pick_batch_tile(bp):
    """Largest tile (multiple of 16, <=256) dividing bp; prefer >=2 grid
    programs once bp >= 32 so v7x's second TensorCore gets work."""
    for tb in (256, 128, 64, 32, 16):
        if bp % tb == 0:
            if bp // tb == 1 and bp >= 32:
                continue
            return tb
    return bp


class PackedParams(NamedTuple):
    w1: jax.Array   # (Kp, Hp) bf16
    b1: jax.Array   # (1, Hp)  f32
    w2: jax.Array   # (Hp, Op) bf16
    b2: jax.Array   # (1, Op)  f32


def prepare_params(params, matmul_dtype=jnp.bfloat16):
    """One-time pack + pad + cast of the RNN weights (hoisted out of the step)."""
    wxh, bxh, whh, bhh, why, bhy = params
    input_size, hidden_size = wxh.shape
    output_size = why.shape[1]

    K = input_size + hidden_size
    Kp = _round_feat(K)
    Hp = _round_feat(hidden_size)
    Op = _round_feat(output_size)
    f32 = jnp.float32

    # Packed first-stage weight: rows [x | h] concatenated BEFORE padding.
    w1 = jnp.zeros((Kp, Hp), f32)
    w1 = w1.at[:input_size, :hidden_size].set(wxh.astype(f32))
    w1 = w1.at[input_size:K, :hidden_size].set(whh.astype(f32))
    b1 = jnp.zeros((1, Hp), f32)
    b1 = b1.at[:, :hidden_size].set((bxh + bhh).reshape(1, -1).astype(f32))

    w2 = jnp.zeros((Hp, Op), f32)
    w2 = w2.at[:hidden_size, :output_size].set(why.astype(f32))
    # Fold the padded-column softmax mask into the bias: padded W2 columns are
    # zero, so their logits are exactly -1e30 and exp underflows to 0.
    b2 = jnp.full((1, Op), -1e30, f32)
    b2 = b2.at[:, :output_size].set(bhy.reshape(1, -1).astype(f32))

    return PackedParams(w1.astype(matmul_dtype), b1, w2.astype(matmul_dtype), b2)


def _vmem_budget_bytes(TB, Kp, Hp, Op):
    act = TB * Kp * 2                       # xh tile (bf16)
    wts = Kp * Hp * 2 + Hp * Op * 2         # weights (bf16)
    bia = (Hp + Op) * 4
    outs = TB * Op * 4 + TB * Hp * 4        # outputs (f32)
    scratch = TB * max(Hp, Op) * 4 * 4      # intermediates
    total = 2 * (act + wts + bia + outs) + scratch   # 2x: double buffering
    return int(min(48 * 1024 * 1024, max(4 * 1024 * 1024, 2 * total)))


# ----------------------------------------------------------------------------
# Per-step forward
# ----------------------------------------------------------------------------
def rnn_model_forward(x, h, packed: PackedParams, *, output_size):
    """x: (B, input_size), h: (B, hidden_size) -> (output, hidden)."""
    B, input_size = x.shape
    hidden_size = h.shape[1]
    K = input_size + hidden_size
    Kp, Hp = packed.w1.shape
    Op = packed.w2.shape[1]

    SUB = 16                      # bf16 packs 2 rows per sublane
    Bp = _round_up(B, SUB)
    TB = _pick_batch_tile(Bp)
    f32 = jnp.float32

    # Per-step activation prep only: concat [x|h] then pad once.
    xh = jnp.concatenate([x, h], axis=1).astype(jnp.bfloat16)
    xh = jnp.pad(xh, ((0, Bp - B), (0, Kp - K)))

    cost = pl.CostEstimate(
        flops=2 * Bp * (Kp * Hp + Hp * Op),
        transcendentals=Bp * (Hp + Op),
        bytes_accessed=(Bp * Kp * 2 + Kp * Hp * 2 + Hp * Op * 2
                        + (Hp + Op) * 4 + Bp * (Op + Hp) * 4),
    )

    out_pad, hid_pad = pl.pallas_call(
        rnn_cell_kernel,
        grid=(Bp // TB,),
        in_specs=[
            pl.BlockSpec((TB, Kp), lambda i: (i, 0)),    # [x|h] batch tile
            pl.BlockSpec((Kp, Hp), lambda i: (0, 0)),    # W1 (VMEM resident)
            pl.BlockSpec((1, Hp), lambda i: (0, 0)),     # b1
            pl.BlockSpec((Hp, Op), lambda i: (0, 0)),    # W2 (VMEM resident)
            pl.BlockSpec((1, Op), lambda i: (0, 0)),     # b2 (mask folded in)
        ],
        out_specs=(
            pl.BlockSpec((TB, Op), lambda i: (i, 0)),    # softmax output
            pl.BlockSpec((TB, Hp), lambda i: (i, 0)),    # hidden state
        ),
        out_shape=(
            jax.ShapeDtypeStruct((Bp, Op), f32),
            jax.ShapeDtypeStruct((Bp, Hp), f32),
        ),
        compiler_params=pltpu.CompilerParams(
            dimension_semantics=("parallel",),
            vmem_limit_bytes=_vmem_budget_bytes(TB, Kp, Hp, Op)),
        cost_estimate=cost,
    )(xh, packed.w1, packed.b1, packed.w2, packed.b2)

    # Strip padding.
    out = out_pad[:B, :output_size].astype(x.dtype)
    hid = hid_pad[:B, :hidden_size].astype(x.dtype)
    return out, hid


# ----------------------------------------------------------------------------
# Params + reference
# ----------------------------------------------------------------------------
def init_params(key, input_size, hidden_size, output_size, dtype=jnp.float32):
    """Deterministic synthetic parameters (PyTorch Linear-style uniform init)."""
    ks = jax.random.split(key, 6)

    def lin(kw, kb, fan_in, fan_out):
        bound = 1.0 / jnp.sqrt(fan_in)
        w = jax.random.uniform(kw, (fan_in, fan_out), dtype, -bound, bound)
        b = jax.random.uniform(kb, (1, fan_out), dtype, -bound, bound)
        return w, b

    wxh, bxh = lin(ks[0], ks[1], input_size, hidden_size)
    whh, bhh = lin(ks[2], ks[3], hidden_size, hidden_size)
    why, bhy = lin(ks[4], ks[5], hidden_size, output_size)
    return (wxh, bxh, whh, bhh, why, bhy)


def reference_forward(x, h, params, matmul_dtype=jnp.float32):
    """Plain-JAX reference; matmul_dtype lets us match the kernel's bf16 ops."""
    wxh, bxh, whh, bhh, why, bhy = params
    d = matmul_dtype
    pre = (jnp.dot(x.astype(d), wxh.astype(d), preferred_element_type=jnp.float32)
           + bxh
           + jnp.dot(h.astype(d), whh.astype(d), preferred_element_type=jnp.float32)
           + bhh)
    hidden = jnp.tanh(pre)
    logits = jnp.dot(hidden.astype(d), why.astype(d),
                     preferred_element_type=jnp.float32) + bhy
    return jax.nn.softmax(logits, axis=-1), hidden


# ----------------------------------------------------------------------------
# Demo / correctness check
# ----------------------------------------------------------------------------
if __name__ == "__main__":
    batch_size = 8
    input_size = 16
    hidden_size = 32
    output_size = 16

    key = jax.random.PRNGKey(0)
    kx, kh, kp = jax.random.split(key, 3)

    x = jax.random.normal(kx, (batch_size, input_size), jnp.float32)
    h = jax.random.normal(kh, (batch_size, hidden_size), jnp.float32)
    params = init_params(kp, input_size, hidden_size, output_size)

    # One-time weight packing (hoisted out of the per-step call).
    packed = prepare_params(params)

    fwd = jax.jit(functools.partial(rnn_model_forward, output_size=output_size))
    out, hid = fwd(x, h, packed)
    jax.block_until_ready((out, hid))

    # Reference with matching bf16 matmul operands (tight tolerance) ...
    ref_out_b, ref_hid_b = reference_forward(x, h, params, matmul_dtype=jnp.bfloat16)
    assert jnp.allclose(out, ref_out_b, atol=1e-2), "output mismatch (bf16 ref)"
    assert jnp.allclose(hid, ref_hid_b, atol=1e-2), "hidden mismatch (bf16 ref)"

    # ... and against the full-f32 reference with a looser bound.
    ref_out_f, ref_hid_f = reference_forward(x, h, params, matmul_dtype=jnp.float32)
    assert jnp.allclose(out, ref_out_f, atol=5e-2), "output mismatch (f32 ref)"
    assert jnp.allclose(hid, ref_hid_f, atol=5e-2), "hidden mismatch (f32 ref)"

    # Softmax rows must sum to 1 (exact divide now).
    assert jnp.allclose(jnp.sum(out, axis=-1), 1.0, atol=1e-5), "softmax rows must sum to 1"

    print("KERNEL_OK")
</pallas_src>

<mosaic_0001>
module attributes {stable_mosaic.version = 11 : i64} {
  func.func @rnn_cell_kernel(%arg0: i32, %arg1: memref<16x128xbf16, #tpu.memory_space<vmem>>, %arg2: memref<128x128xbf16, #tpu.memory_space<vmem>>, %arg3: memref<1x128xf32, #tpu.memory_space<vmem>>, %arg4: memref<128x128xbf16, #tpu.memory_space<vmem>>, %arg5: memref<1x128xf32, #tpu.memory_space<vmem>>, %arg6: memref<16x128xf32, #tpu.memory_space<vmem>>, %arg7: memref<16x128xf32, #tpu.memory_space<vmem>>) attributes {dimension_semantics = [#tpu.dimension_semantics<parallel>], iteration_bounds = array<i64: 1>, scalar_prefetch = 0 : i64, scratch_operands = 0 : i64, tpu.core_type = #tpu.core_type<tc>, window_params = [{transform_indices = @transform_0, window_bounds = array<i64: 16, 128>}, {pipeline_mode = #tpu.pipeline_mode<synchronous>, transform_indices = @transform_1, window_bounds = array<i64: 128, 128>}, {pipeline_mode = #tpu.pipeline_mode<synchronous>, transform_indices = @transform_2, window_bounds = array<i64: 1, 128>}, {pipeline_mode = #tpu.pipeline_mode<synchronous>, transform_indices = @transform_3, window_bounds = array<i64: 128, 128>}, {pipeline_mode = #tpu.pipeline_mode<synchronous>, transform_indices = @transform_4, window_bounds = array<i64: 1, 128>}, {transform_indices = @transform_5, window_bounds = array<i64: 16, 128>}, {transform_indices = @transform_6, window_bounds = array<i64: 16, 128>}]} {
    %c0 = arith.constant 0 : index
    %c0_0 = arith.constant 0 : index
    %0 = vector.load %arg1[%c0, %c0_0] : memref<16x128xbf16, #tpu.memory_space<vmem>>, vector<16x128xbf16>
    %c0_1 = arith.constant 0 : index
    %c0_2 = arith.constant 0 : index
    %1 = vector.load %arg2[%c0_1, %c0_2] : memref<128x128xbf16, #tpu.memory_space<vmem>>, vector<128x128xbf16>
    %cst = arith.constant dense<0.000000e+00> : vector<16x128xf32>
    %2 = tpu.matmul %0, %1, %cst {dimension_numbers = #tpu.dot_dimension_numbers<[1], [0], [0], [1], [0, 0, 1, 1], [], []>} : vector<16x128xbf16>, vector<128x128xbf16>, vector<16x128xf32> -> vector<16x128xf32>
    %c0_3 = arith.constant 0 : index
    %c0_4 = arith.constant 0 : index
    %3 = vector.load %arg3[%c0_3, %c0_4] : memref<1x128xf32, #tpu.memory_space<vmem>>, vector<1x128xf32>
    %4 = vector.broadcast %3 : vector<1x128xf32> to vector<16x128xf32>
    %5 = arith.addf %2, %4 : vector<16x128xf32>
    %6 = math.tanh %5 : vector<16x128xf32>
    %7 = arith.truncf %6 : vector<16x128xf32> to vector<16x128xbf16>
    %c0_5 = arith.constant 0 : index
    %c0_6 = arith.constant 0 : index
    %8 = vector.load %arg4[%c0_5, %c0_6] : memref<128x128xbf16, #tpu.memory_space<vmem>>, vector<128x128xbf16>
    %cst_7 = arith.constant dense<0.000000e+00> : vector<16x128xf32>
    %9 = tpu.matmul %7, %8, %cst_7 {dimension_numbers = #tpu.dot_dimension_numbers<[1], [0], [0], [1], [0, 0, 1, 1], [], []>} : vector<16x128xbf16>, vector<128x128xbf16>, vector<16x128xf32> -> vector<16x128xf32>
    %c0_8 = arith.constant 0 : index
    %c0_9 = arith.constant 0 : index
    %10 = vector.load %arg5[%c0_8, %c0_9] : memref<1x128xf32, #tpu.memory_space<vmem>>, vector<1x128xf32>
    %11 = vector.broadcast %10 : vector<1x128xf32> to vector<16x128xf32>
    %12 = arith.addf %9, %11 : vector<16x128xf32>
    %cst_10 = arith.constant dense<0xFF800000> : vector<16xf32>
    %13 = vector.multi_reduction <maximumf>, %12, %cst_10 [1] : vector<16x128xf32> to vector<16xf32>
    %14 = vector.shape_cast %13 : vector<16xf32> to vector<16x1xf32>
    %15 = vector.broadcast %14 : vector<16x1xf32> to vector<16x128xf32>
    %16 = arith.subf %12, %15 : vector<16x128xf32>
    %17 = math.exp %16 : vector<16x128xf32>
    %cst_11 = arith.constant dense<0.000000e+00> : vector<16xf32>
    %18 = vector.multi_reduction <add>, %17, %cst_11 [1] : vector<16x128xf32> to vector<16xf32>
    %19 = vector.shape_cast %18 : vector<16xf32> to vector<16x1xf32>
    %20 = vector.broadcast %19 : vector<16x1xf32> to vector<16x128xf32>
    %21 = arith.divf %17, %20 : vector<16x128xf32>
    %c0_12 = arith.constant 0 : index
    %c0_13 = arith.constant 0 : index
    %22 = vector.load %arg6[%c0_12, %c0_13] : memref<16x128xf32, #tpu.memory_space<vmem>>, vector<16x128xf32>
    tpu.vector_store %arg6[%c0_12, %c0_13], %21 {strides = array<i32>} : memref<16x128xf32, #tpu.memory_space<vmem>>, vector<16x128xf32>,
    %c0_14 = arith.constant 0 : index
    %c0_15 = arith.constant 0 : index
    %23 = vector.load %arg7[%c0_14, %c0_15] : memref<16x128xf32, #tpu.memory_space<vmem>>, vector<16x128xf32>
    tpu.vector_store %arg7[%c0_14, %c0_15], %6 {strides = array<i32>} : memref<16x128xf32, #tpu.memory_space<vmem>>, vector<16x128xf32>,
    return
  }
  func.func @transform_0(%arg0: i32) -> (i32, i32) {
    %c0_i32 = arith.constant 0 : i32
    %c0_i32_0 = arith.constant 0 : i32
    return %arg0, %c0_i32 : i32, i32
  }
  func.func @transform_1(%arg0: i32) -> (i32, i32) {
    %c0_i32 = arith.constant 0 : i32
    %c0_i32_0 = arith.constant 0 : i32
    %c0_i32_1 = arith.constant 0 : i32
    return %c0_i32, %c0_i32_0 : i32, i32
  }
  func.func @transform_2(%arg0: i32) -> (i32, i32) {
    %c0_i32 = arith.constant 0 : i32
    %c0_i32_0 = arith.constant 0 : i32
    %c0_i32_1 = arith.constant 0 : i32
    return %c0_i32, %c0_i32_0 : i32, i32
  }
  func.func @transform_3(%arg0: i32) -> (i32, i32) {
    %c0_i32 = arith.constant 0 : i32
    %c0_i32_0 = arith.constant 0 : i32
    %c0_i32_1 = arith.constant 0 : i32
    return %c0_i32, %c0_i32_0 : i32, i32
  }
  func.func @transform_4(%arg0: i32) -> (i32, i32) {
    %c0_i32 = arith.constant 0 : i32
    %c0_i32_0 = arith.constant 0 : i32
    %c0_i32_1 = arith.constant 0 : i32
    return %c0_i32, %c0_i32_0 : i32, i32
  }
  func.func @transform_5(%arg0: i32) -> (i32, i32) {
    %c0_i32 = arith.constant 0 : i32
    %c0_i32_0 = arith.constant 0 : i32
    return %arg0, %c0_i32 : i32, i32
  }
  func.func @transform_6(%arg0: i32) -> (i32, i32) {
    %c0_i32 = arith.constant 0 : i32
    %c0_i32_0 = arith.constant 0 : i32
    return %arg0, %c0_i32 : i32, i32
  }
}

</mosaic_0001>

<bundles_post_ra>
// kernel: rnn_model_forward.1
= control target key start
LH: loop header
LB: loop body
LE: loop exit
PB: predicated region body
PF: predicated region fallthrough
CT: control target
= control target key end

     0   :  { %12 = vsyncpa [#allocation3], 0  ;;  %s564_s0 = inlined_call_operand.vmem [shape: bf16[16,128], index: 0, kind: input, shape index: {}]   ;;  %s565_s1 = inlined_call_operand.hbm [shape: bf16[128,128], index: 1, kind: input, shape index: {}]   ;;  %s566_s2 = inlined_call_operand.vmem [shape: f32[1,128], index: 2, kind: input, shape index: {}]   ;;  %s567_s3 = inlined_call_operand.hbm [shape: bf16[128,128], index: 3, kind: input, shape index: {}]   ;;  %s568_s4 = inlined_call_operand.vmem [shape: f32[1,128], index: 4, kind: input, shape index: {}]   ;;  %s569_s5 = inlined_call_operand.vmem [shape: f32[16,128], index: 5, kind: output, shape index: {0}]   ;;  %s570_s6 = inlined_call_operand.vmem [shape: f32[16,128], index: 6, kind: output, shape index: {1}]  }
   0x1   :  { %13 = vsyncpa [#allocation5], 0  ;;  %s478_s21 = smov [#allocation2]   ;;  %s430_s25 = scalar_lea.hbm %s565_s1, 1024 }
   0x2   :  { %s21_s22 = sshll.u32 %s478_s21, 4  ;;  %p431_p0 = scmp.ne.s32.totalorder %s565_s1, %s430_s25  ;;  %s22_s22 = int_to_ptr.vmem [resolvable:$true] %s21_s22 }
   0x3   :  { %p434_p1 = scmp.lt.u32.totalorder %s430_s25, %s565_s1 }
   0x5   :  { %p436_p2 = pnand %p434_p1, %p431_p0 }
   0x7   :  { %439 = shalt.err (!%p436_p2)
}
   0x8   :  { %s440_s30 = scalar_lea.vmem %s22_s22, 1024  ;;  %p445_p4 = scmp.lt.s32.totalorder %s22_s22, %s22_s22 }
   0x9   :  { %p441_p3 = scmp.ne.s32.totalorder %s22_s22, %s440_s30  ;;  %p446_p5 = scmp.lt.s32.totalorder %s440_s30, %s440_s30 }
   0xb   :  { %p447_p6 = por %p446_p5, %p445_p4 }
   0xd   :  { %p448_p7 = pnand %p447_p6, %p441_p3 }
   0xf   :  { %451 = shalt.err (!%p448_p7)
}
  0x10   :  { %s479_s7 = smov 64   ;;  %s480_s8 = smov 4  }
  0x11   :  { %27 = dma.hbm_to_vmem [thread:$0]  %s565_s1, 1024, %s22_s22, [#allocation3], %s479_s7, %s479_s7, %s480_s8  }
  0x12   :  { %s481_s11 = smov [#allocation4]   ;;  %s452_s15 = scalar_lea.hbm %s567_s3, 1024 }
  0x13   :  { %s35_s12 = sshll.u32 %s481_s11, 4  ;;  %p453_p8 = scmp.ne.s32.totalorder %s567_s3, %s452_s15  ;;  %s36_s12 = int_to_ptr.vmem [resolvable:$true] %s35_s12 }
  0x14   :  { %p456_p9 = scmp.lt.u32.totalorder %s452_s15, %s567_s3 }
  0x16   :  { %p458_p10 = pnand %p456_p9, %p453_p8 }
  0x18   :  { %461 = shalt.err (!%p458_p10)
}
  0x19   :  { %s462_s20 = scalar_lea.vmem %s36_s12, 1024  ;;  %p467_p12 = scmp.lt.s32.totalorder %s36_s12, %s36_s12 }
  0x1a   :  { %p463_p11 = scmp.ne.s32.totalorder %s36_s12, %s462_s20  ;;  %p468_p13 = scmp.lt.s32.totalorder %s462_s20, %s462_s20 }
  0x1c   :  { %p469_p0 = por %p468_p13, %p467_p12 }
  0x1e   :  { %p470_p1 = pnand %p469_p0, %p463_p11 }
  0x20   :  { %473 = shalt.err (!%p470_p1)
}
  0x21   :  { %41 = dma.hbm_to_vmem [thread:$0]  %s567_s3, 1024, %s36_s12, [#allocation5], %s479_s7, %s479_s7, %s480_s8  }
  0x22   :  { %474 = dma.done.wait [#allocation3], 1024  }
  0x23   :  { %475 = vsyncadd [#allocation3], 4294966272 }
  0x24   :  { %476 = dma.done.wait [#allocation5], 1024  }
  0x25   :  { %477 = vsyncadd [#allocation5], 4294966272  ;;  %v482_v0 = vmov 0.0   ;;  %vm483_vm0 = vmmov 0   ;;  %v401_v1 = vld [vmem:[#allocation2] sm:$0xff]   ;;  %v402_v2 = vld [vmem:[#allocation2 + $0x8] sm:$0xff]  }
  0x26   :  { %355 = vmatprep.subr.bf16.mxu0 %v482_v0  ;;  %371 = vmatprep.mubr.msk.bf16.mxu0 %vm483_vm0, %v482_v0  ;;  %v403_v3 = vld [vmem:[#allocation2 + $0x10] sm:$0xff]   ;;  %v410_v4 = vld [vmem:[#allocation4] sm:$0xff]   ;;  %v404_v5 = vld [vmem:[#allocation2 + $0x18] sm:$0xff]  }
  0x27   :  { %375 = vmatprep.subr.bf16.mxu1 %v482_v0  ;;  %391 = vmatprep.mubr.msk.bf16.mxu1 %vm483_vm0, %v482_v0  ;;  %v411_v6 = vld [vmem:[#allocation4 + $0x8] sm:$0xff]   ;;  %v405_v7 = vld [vmem:[#allocation2 + $0x20] sm:$0xff]   ;;  %v412_v8 = vld [vmem:[#allocation4 + $0x10] sm:$0xff]  }
  0x28   :  { %356 = vmatpush3.bf16.msra.mxu0 %v401_v1  ;;  %376 = vmatpush3.bf16.msra.mxu1 %v410_v4  ;;  %v406_v9 = vld [vmem:[#allocation2 + $0x28] sm:$0xff]   ;;  %v413_v10 = vld [vmem:[#allocation4 + $0x18] sm:$0xff]   ;;  %v407_v11 = vld [vmem:[#allocation2 + $0x30] sm:$0xff]  }
  0x29   :  { %357 = vmatprep.subr.bf16.mxu0 %v482_v0  ;;  %377 = vmatprep.subr.bf16.mxu1 %v482_v0  ;;  %v408_v12 = vld [vmem:[#allocation2 + $0x38] sm:$0xff]   ;;  %v409_v13 = vld [vmem:[%s564_s0] sm:$0xff]   ;;  %v415_v15 = vld [vmem:[#allocation4 + $0x28] sm:$0xff]  }
  0x2a   :  { %v414_v14 = vld [vmem:[#allocation4 + $0x20] sm:$0xff]   ;;  %v416_v16 = vld [vmem:[#allocation4 + $0x30] sm:$0xff]   ;;  %v417_v17 = vld [vmem:[#allocation4 + $0x38] sm:$0xff]  }
  0x2b   :  { %v318_v18 = vld [vmem:[%s566_s2] ss:$0 sm:$0xff] }
  0x2c   :  { %358 = vmatpush3.bf16.msra.mxu0 %v402_v2  ;;  %378 = vmatpush3.bf16.msra.mxu1 %v411_v6  ;;  %v328_v28 = vld [vmem:[%s568_s4] ss:$0 sm:$0xff] }
  0x2d   :  { %359 = vmatprep.subr.bf16.mxu0 %v482_v0  ;;  %379 = vmatprep.subr.bf16.mxu1 %v482_v0 }
  0x30   :  { %360 = vmatpush3.bf16.msra.mxu0 %v403_v3  ;;  %380 = vmatpush3.bf16.msra.mxu1 %v412_v8 }
  0x31   :  { %361 = vmatprep.subr.bf16.mxu0 %v482_v0  ;;  %381 = vmatprep.subr.bf16.mxu1 %v482_v0 }
  0x34   :  { %362 = vmatpush3.bf16.msra.mxu0 %v404_v5  ;;  %382 = vmatpush3.bf16.msra.mxu1 %v413_v10 }
  0x35   :  { %363 = vmatprep.subr.bf16.mxu0 %v482_v0  ;;  %383 = vmatprep.subr.bf16.mxu1 %v482_v0 }
  0x38   :  { %364 = vmatpush3.bf16.msra.mxu0 %v405_v7  ;;  %384 = vmatpush3.bf16.msra.mxu1 %v414_v14 }
  0x39   :  { %365 = vmatprep.subr.bf16.mxu0 %v482_v0  ;;  %385 = vmatprep.subr.bf16.mxu1 %v482_v0 }
  0x3c   :  { %366 = vmatpush3.bf16.msra.mxu0 %v406_v9  ;;  %386 = vmatpush3.bf16.msra.mxu1 %v415_v15 }
  0x3d   :  { %367 = vmatprep.subr.bf16.mxu0 %v482_v0  ;;  %387 = vmatprep.subr.bf16.mxu1 %v482_v0 }
  0x40   :  { %368 = vmatpush3.bf16.msra.mxu0 %v407_v11  ;;  %388 = vmatpush3.bf16.msra.mxu1 %v416_v16 }
  0x41   :  { %369 = vmatprep.subr.bf16.mxu0 %v482_v0  ;;  %389 = vmatprep.subr.bf16.mxu1 %v482_v0 }
  0x44   :  { %370 = vmatpush3.bf16.msra.mxu0 %v408_v12  ;;  %390 = vmatpush3.bf16.msra.mxu1 %v417_v17 }
  0x47   :  { %372 = vmatmul.mubr.bf16.vlgmr.msra.gmra.mrb[0].mxu0 %v409_v13 }
 0x11a   :  { %v164_v19 = vpop.f32.mrb[0].mxu0 }
 0x11b   :  { %v165_v20 = vadd.f32 %v318_v18, %v164_v19  ;;  %v373_v21 = vpop.f32.mrb[1].mxu0 }
 0x11c   :  { %v167_v22 = vpop.f32.mrb[2].mxu0 }
 0x11d   :  { %418 = vtanh.f32 %v165_v20  ;;  %v168_v23 = vadd.f32 %v318_v18, %v167_v22  ;;  %v374_v24 = vpop.f32.mrb[3].mxu0 }
 0x11f   :  { %420 = vtanh.f32 %v168_v23 }
 0x127   :  { %v419_v25 = vpop.eup %418 }
 0x128   :  { %306 = vst [vmem:[%s570_s6] sm:$0xff] %v419_v25 }
 0x129   :  { %v421_v26 = vpop.eup %420 }
 0x12a   :  { %307 = vst [vmem:[%s570_s6 + $0x8] sm:$0xff] %v421_v26  ;;  %v173_v27 = vpack.c.bf16 %v421_v26, %v419_v25 }
 0x12c   :  { %392 = vmatmul.mubr.bf16.vlgmr.msra.gmra.mrb[0].mxu1 %v173_v27 }
 0x1ff   :  { %v279_v29 = vpop.f32.mrb[0].mxu1 }
 0x200   :  { %v280_v30 = vadd.f32 %v328_v28, %v279_v29  ;;  %v393_v31 = vpop.f32.mrb[1].mxu1 }
 0x201   :  { %v282_v32 = vpop.f32.mrb[2].mxu1 }
 0x202   :  { %286 = vmax.xlane.f32.xlu0 %v280_v30  ;;  %v394_v33 = vpop.f32.mrb[3].mxu1  ;;  %v283_v34 = vadd.f32 %v328_v28, %v282_v32 }
 0x206   :  { %288 = vmax.xlane.f32.xlu0 %v283_v34 }
 0x28f   :  { %v287_v35 = vpop.xlane.xlu0 %286 }
 0x290   :  { %v290_v36 = vsub.f32 %v280_v30, %v287_v35 }
 0x292   :  { %v292_v37 = vmul.f32 1.442695, %v290_v36 }
 0x293   :  { %v289_v38 = vpop.xlane.xlu0 %288 }
 0x294   :  { %422 = vpow2.f32 %v292_v37  ;;  %v291_v39 = vsub.f32 %v283_v34, %v289_v38 }
 0x296   :  { %v294_v40 = vmul.f32 1.442695, %v291_v39 }
 0x298   :  { %424 = vpow2.f32 %v294_v40 }
 0x29e   :  { %v423_v41 = vpop.eup %422 }
 0x29f   :  { %296 = vadd.xlane.f32.xlu1 %v423_v41 }
 0x2a2   :  { %v425_v42 = vpop.eup %424 }
 0x2a3   :  { %298 = vadd.xlane.f32.xlu1 %v425_v42 }
 0x32c   :  { %v297_v43 = vpop.xlane.xlu1 %296 }
 0x32d   :  { %426 = vrcp.f32 %v297_v43 }
 0x330   :  { %v299_v44 = vpop.xlane.xlu1 %298 }
 0x331   :  { %428 = vrcp.f32 %v299_v44 }
 0x337   :  { %v427_v45 = vpop.eup %426 }
 0x338   :  { %v301_v46 = vmul.f32 %v427_v45, %v423_v41 }
 0x33a   :  { %304 = vst [vmem:[%s569_s5] sm:$0xff] %v301_v46 }
 0x33b   :  { %v429_v47 = vpop.eup %428 }
 0x33c   :  { %v303_v48 = vmul.f32 %v429_v47, %v425_v42 }
 0x33e   :  { %305 = vst [vmem:[%s569_s5 + $0x8] sm:$0xff] %v303_v48 }
 0x33f   :  { %316 = vsyncpa [#allocation3], 1 }
 0x340   :  { %317 = vsyncpa [#allocation5], 1 }

</bundles_post_ra>
